<compile_context>
chip_gen: v7x
topology: tpu7x:2x2x1
jax: 0.10.0
libtpu: 0.0.40
codegen_flags: <defaults>
</compile_context>

<pallas_src>
import numpy as np
import jax
import jax.numpy as jnp
from jax.experimental import pallas as pl
from jax.experimental.pallas import tpu as pltpu

# ----- model dims (small, consistent with the PyTorch module) -----
B = 2        # batch
E = 8        # num_events
F = 4        # num_features per event
D = 8        # embedding_dim
T = 4        # tss_dim
H = 16       # hidden_dim
DT = D + T   # embedding_dim + tss_dim
EF = E * F
VOCAB = 50   # vocabulary_size

# ----- embedding-slab layout: rows [0:B*E] are (b,e)-rows (lanes [0:F*D] =
# value-scaled embeddings f-major, lane [F*D] = event time); rows
# [B*E:B*E+B*F] are (b,f)-rows (lanes [0:E*D] = the same embeddings e-major).
ES_ROWS = B * E + B * F      # 24
ES_COLS = E * D              # 64
C_TIME = F * D               # 32

# ----- bdata (B,128) lane layout -----
C_MASK = 2 * EF              # 64  masks  (E lanes)
C_PRED = 2 * EF + E          # 72  pred-event embedding (D lanes)

# ----- parameter-slab layout (all offsets static) -----
P_ROWS = 64
C_T2VW = 0                   # time2vec frequencies      (D)
C_T2VB = C_T2VW + D          # time2vec phases           (D)
C_BQ = C_T2VB + D            # folded QKV bias tl_b@W2b  (3*DT)
C_FC1B = C_BQ + 3 * DT       # fc1 bias                  (H)
C_FC2W = C_FC1B + H          # fc2 weight                (H)
C_BIAS = C_FC2W + H          # fc2_b + lr_bias combined  (1)
R_WF = 8                     # (2D, 3DT) fused event-attention QKV weight
R_W1 = R_WF + 2 * D          # (D, 3D)   field-attention [W1_1|W1_2|W1_3]
R_FC1 = R_W1 + D             # (3D+T, H) fc1 weight


def difm_kernel(eslab_ref, bdata_ref, pslab_ref, out_ref):
    f32, bf16 = jnp.float32, jnp.bfloat16
    p = pslab_ref
    es = eslab_ref[...]                               # (24, 64)
    bd = bdata_ref[...]                               # (B, 128)

    # ---------- (b,e)-row view: FM over features + time2vec ----------
    xe = es[0:B * E, :]                               # (B*E, 64)
    xg = [xe[:, k * D:(k + 1) * D] for k in range(F)]
    fsum = xg[0] + xg[1] + xg[2] + xg[3]
    fsqs = xg[0] * xg[0] + xg[1] * xg[1] + xg[2] * xg[2] + xg[3] * xg[3]
    fm1 = 0.5 * (fsum * fsum - fsqs)                  # (B*E, D)

    t = xe[:, C_TIME:C_TIME + 1]                      # (B*E, 1) event times
    arg = t * p[0:1, C_T2VW:C_T2VW + D] + p[0:1, C_T2VB:C_T2VB + D]   # (B*E, D)
    lane = jax.lax.broadcasted_iota(jnp.int32, arg.shape, 1)
    te = jnp.where(lane == 0, arg, jnp.sin(arg))      # (B*E, D) time2vec

    # ---------- event attention (time_linear folded into the QKV weight) ----------
    x2 = jnp.concatenate([fm1, te], axis=-1)          # (B*E, 2D)
    wf = p[R_WF:R_WF + 2 * D, 0:3 * DT].astype(bf16)  # (2D, 3DT)
    bq = p[0:1, C_BQ:C_BQ + 3 * DT]                   # (1, 3DT)
    qkv2 = jnp.dot(x2.astype(bf16), wf, preferred_element_type=f32) + bq   # (B*E, 3DT)
    qkv3 = qkv2.reshape(B, E, 3 * DT)                 # tile-aligned reshape
    Q2 = qkv3[..., 0:DT]
    K2 = qkv3[..., DT:2 * DT]
    V2 = qkv3[..., 2 * DT:3 * DT]
    masks = bd[:, C_MASK:C_MASK + E]                  # (B, E)
    a2 = jnp.sum(Q2 * K2, axis=-1) * (1.0 / np.sqrt(float(DT)))
    a2 = a2 - (1.0 - masks) * 1e12
    # Max-subtraction keeps even a fully-masked row finite (same numerics as the
    # reference softmax of the masked logits).
    m2 = jnp.max(a2, axis=1, keepdims=True)
    e2 = jnp.exp(a2 - m2)
    aw2 = e2 * pl.reciprocal(jnp.sum(e2, axis=1, keepdims=True), approx=True)
    emb_his = jnp.sum(aw2[..., None] * V2, axis=1)    # (B, DT)

    # ---------- FM over events ((b,f)-row view + time field) ----------
    xf = es[B * E:B * E + B * F, :]                   # (B*F, E*D)
    esum = xf[:, 0:D]
    esqs = xf[:, 0:D] * xf[:, 0:D]
    for k in range(1, E):
        xk = xf[:, k * D:(k + 1) * D]
        esum = esum + xk
        esqs = esqs + xk * xk
    fm2f = 0.5 * (esum * esum - esqs)                 # (B*F, D)
    te3 = te.reshape(B, E, D)                         # tile-aligned reshape
    tsum = jnp.sum(te3, axis=1)
    tsqs = jnp.sum(te3 * te3, axis=1)
    fm2t = 0.5 * (tsum * tsum - tsqs)                 # (B, D)

    # ---------- field attention: two tiny dots on the same resident W1 ----------
    w1 = p[R_W1:R_W1 + D, 0:3 * D].astype(bf16)       # (D, 3D) = [W1_1|W1_2|W1_3]
    qkvf = jnp.dot(fm2f.astype(bf16), w1, preferred_element_type=f32)   # (B*F, 3D)
    qkvt = jnp.dot(fm2t.astype(bf16), w1, preferred_element_type=f32)   # (B, 3D)
    inv_sd = 1.0 / np.sqrt(float(D))
    af = (jnp.sum(qkvf[:, 0:D] * qkvf[:, D:2 * D], axis=-1, keepdims=True)
          * inv_sd).reshape(B, F)                     # (B, F)
    at = jnp.sum(qkvt[:, 0:D] * qkvt[:, D:2 * D], axis=-1, keepdims=True) * inv_sd
    mf = jnp.maximum(jnp.max(af, axis=1, keepdims=True), at)
    ef = jnp.exp(af - mf)
    et = jnp.exp(at - mf)
    inv_den = pl.reciprocal(jnp.sum(ef, axis=1, keepdims=True) + et, approx=True)
    Vf = qkvf[:, 2 * D:3 * D].reshape(B, F, D)
    Vt = qkvt[:, 2 * D:3 * D]                         # (B, D)
    emb_f = (jnp.sum(ef[..., None] * Vf, axis=1) + et * Vt) * inv_den   # (B, D)

    # ---------- deep part ----------
    pred = bd[:, C_PRED:C_PRED + D]                   # (B, D)
    deep_in = jnp.concatenate([emb_his, emb_f, pred], axis=-1)          # (B, 3D+T)
    fc1_w = p[R_FC1:R_FC1 + 3 * D + T, 0:H].astype(bf16)
    h1 = jnp.maximum(
        jnp.dot(deep_in.astype(bf16), fc1_w, preferred_element_type=f32)
        + p[0:1, C_FC1B:C_FC1B + H], 0.0)             # ReLU
    # TODO(synk): dropout is modeled as eval-mode identity (inference path).
    deep_out = jnp.sum(h1 * p[0:1, C_FC2W:C_FC2W + H], axis=-1, keepdims=True)

    # ---------- wide / LR part + exact sigmoid ----------
    lr_out = jnp.sum(bd[:, 0:EF] * bd[:, EF:2 * EF], axis=-1, keepdims=True)
    logit = deep_out + lr_out + p[0:1, C_BIAS:C_BIAS + 1]
    sig = 1.0 / (1.0 + jnp.exp(-logit))               # exact reciprocal for the output
    out_ref[...] = jnp.broadcast_to(sig, (B, 128))    # lane-dense unmasked store


def _pack_params(params):
    """One-time host-side packing of all small parameters into a (64,128) slab.
    time_linear is folded into the event-attention QKV weight/bias here:
      qkv = fm1 @ W2[:D] + (te @ tl_w + tl_b) @ W2[D:]
          = [fm1 | te] @ [[W2[:D]], [tl_w @ W2[D:]]] + tl_b @ W2[D:]
    """
    g = lambda k: np.asarray(params[k], np.float32)
    slab = np.zeros((P_ROWS, 128), np.float32)
    slab[0, C_T2VW:C_T2VW + D] = g('t2v_w')[0]
    slab[0, C_T2VB:C_T2VB + D] = g('t2v_b')[0]
    w2cat = np.concatenate([g('w21'), g('w22'), g('w23')], axis=1)      # (DT, 3DT)
    slab[R_WF:R_WF + 2 * D, 0:3 * DT] = np.concatenate(
        [w2cat[:D], g('tl_w') @ w2cat[D:]], axis=0)                     # (2D, 3DT)
    slab[0, C_BQ:C_BQ + 3 * DT] = (g('tl_b') @ w2cat[D:])[0]
    slab[R_W1:R_W1 + D, 0:3 * D] = np.concatenate(
        [g('w11'), g('w12'), g('w13')], axis=1)
    slab[R_FC1:R_FC1 + 3 * D + T, 0:H] = g('fc1_w')
    slab[0, C_FC1B:C_FC1B + H] = g('fc1_b')[0]
    slab[0, C_FC2W:C_FC2W + H] = g('fc2_w')[0]
    slab[0, C_BIAS] = float(g('fc2_b')[0, 0]) + float(g('lr_bias')[0, 0])
    return jnp.asarray(slab)


@jax.jit
def _difm_call(embs, vals, times, masks, pred_embs, pred_vals, lr_w, lr_vals, pslab):
    f32 = jnp.float32
    # Gather epilogue: pre-scale embeddings by values (removes a kernel input),
    # then pack everything into 3 lane-dense slabs (3 DMA descriptors total).
    initial = embs * vals[..., None]                                   # (B,E,F,D)
    rows_be = jnp.concatenate(
        [initial.reshape(B * E, F * D), times.reshape(B * E, 1),
         jnp.zeros((B * E, ES_COLS - F * D - 1), f32)], axis=1)        # (B*E, 64)
    rows_bf = jnp.transpose(initial, (0, 2, 1, 3)).reshape(B * F, E * D)
    eslab = jnp.concatenate([rows_be, rows_bf], axis=0)                # (24, 64)

    pred = jnp.sum(pred_embs * pred_vals[..., None], axis=1)           # (B, D)
    bdata = jnp.concatenate(
        [lr_w, lr_vals, masks, pred,
         jnp.zeros((B, 128 - (2 * EF + E + D)), f32)], axis=1)         # (B, 128)

    # No grid: single invocation, whole arrays resident in VMEM (~50 KB total).
    # For production batch sizes, batch would become a leading "parallel" grid
    # axis (sharded across v7x's two TensorCores); at B=2 that is pure overhead.
    vmem = pl.BlockSpec(memory_space=pltpu.MemorySpace.VMEM)
    bytes_accessed = (eslab.size + bdata.size + pslab.size + B * 128) * 4
    out = pl.pallas_call(
        difm_kernel,
        out_shape=jax.ShapeDtypeStruct((B, 128), jnp.float32),
        in_specs=[vmem, vmem, vmem],
        out_specs=vmem,
        cost_estimate=pl.CostEstimate(flops=20000, transcendentals=256,
                                      bytes_accessed=int(bytes_accessed)),
    )(eslab, bdata, pslab)
    return out[:, 0]


def difm_forward(inputs, params):
    pslab = _pack_params(params)
    return _difm_call(inputs['embs'], inputs['vals'], inputs['times'], inputs['masks'],
                      inputs['pred_embs'], inputs['pred_vals'],
                      inputs['lr_w'], inputs['lr_vals'], pslab)


def reference(inputs, params):
    """Pure-JAX mirror of the PyTorch forward (7-element-list path)."""
    embs, vals = inputs['embs'], inputs['vals']
    times, masks = inputs['times'], inputs['masks']
    initial = embs * vals[..., None]
    arg = times[..., None] * params['t2v_w'][0] + params['t2v_b'][0]
    time_embs = jnp.concatenate([arg[..., :1], jnp.sin(arg[..., 1:])], axis=-1)
    embs_full = jnp.concatenate([initial, time_embs[:, :, None, :]], axis=2)
    fm1 = 0.5 * (jnp.sum(initial, 2) ** 2 - jnp.sum(initial ** 2, 2))
    time_out = time_embs @ params['tl_w'] + params['tl_b'][0]
    fm1c = jnp.concatenate([fm1, time_out], axis=-1)

    def attn(x, w1, w2, w3, mask):
        Q, K, V = x @ w1, x @ w2, x @ w3
        a = jnp.sum(Q * K, -1) / jnp.sqrt(float(x.shape[-1]))
        if mask is not None:
            a = a - (1.0 - mask) * 1e12
        a = jax.nn.softmax(a, axis=1)
        return a[..., None] * V

    emb_his = jnp.sum(attn(fm1c, params['w21'], params['w22'], params['w23'], masks), axis=1)
    fm2 = 0.5 * (jnp.sum(embs_full, 1) ** 2 - jnp.sum(embs_full ** 2, 1))
    emb_f = jnp.sum(attn(fm2, params['w11'], params['w12'], params['w13'], None), axis=1)
    pred = jnp.sum(inputs['pred_embs'] * inputs['pred_vals'][..., None], axis=1)
    deep_in = jnp.concatenate([emb_his, emb_f, pred], axis=-1)
    h = jnp.maximum(deep_in @ params['fc1_w'] + params['fc1_b'][0], 0.0)
    deep_out = jnp.sum(h * params['fc2_w'], axis=-1, keepdims=True) + params['fc2_b']
    lr = jnp.sum(inputs['lr_w'] * inputs['lr_vals'], axis=1, keepdims=True) + params['lr_bias']
    return jax.nn.sigmoid(deep_out + lr)[:, 0]


if __name__ == "__main__":
    key = jax.random.PRNGKey(0)
    ks = jax.random.split(key, 21)

    # ----- deterministic parameters (shapes follow DIFM_for_fp.__init__) -----
    params = dict(
        emb_table=0.1 * jax.random.normal(ks[0], (VOCAB + 1, D), jnp.float32),
        wide_table=0.1 * jax.random.normal(ks[1], (VOCAB, 1), jnp.float32),
        t2v_w=jax.random.normal(ks[2], (1, D), jnp.float32),      # time2vec freq (idx 0 = linear)
        t2v_b=jax.random.normal(ks[3], (1, D), jnp.float32),
        tl_w=0.1 * jax.random.normal(ks[4], (D, T), jnp.float32),   # time_linear (in,out)
        tl_b=0.1 * jax.random.normal(ks[5], (1, T), jnp.float32),
        w11=0.01 * jax.random.normal(ks[6], (D, D), jnp.float32),
        w12=0.01 * jax.random.normal(ks[7], (D, D), jnp.float32),
        w13=0.01 * jax.random.normal(ks[8], (D, D), jnp.float32),
        w21=0.01 * jax.random.normal(ks[9], (DT, DT), jnp.float32),
        w22=0.01 * jax.random.normal(ks[10], (DT, DT), jnp.float32),
        w23=0.01 * jax.random.normal(ks[11], (DT, DT), jnp.float32),
        fc1_w=0.1 * jax.random.normal(ks[12], (3 * D + T, H), jnp.float32),
        fc1_b=0.1 * jax.random.normal(ks[13], (1, H), jnp.float32),
        fc2_w=0.1 * jax.random.normal(ks[14], (1, H), jnp.float32),
        fc2_b=0.1 * jax.random.normal(ks[15], (1, 1), jnp.float32),
        lr_bias=0.01 * jax.random.normal(ks[16], (1, 1), jnp.float32),
    )

    # ----- deterministic inputs (list-of-7 path of the PyTorch forward) -----
    ids = jax.random.randint(ks[17], (B, E, F), 0, VOCAB)
    values = jax.random.uniform(ks[18], (B, E, F), jnp.float32)
    times = jax.random.uniform(ks[19], (B, E), jnp.float32)
    seq_length = jnp.array([E, E - 3], dtype=jnp.int32)
    masks = (jnp.arange(E)[None, :] < seq_length[:, None]).astype(jnp.float32)

    # Glue: embedding-table gathers stay in plain JAX.
    embs = params['emb_table'][ids]                                 # (B,E,F,D)
    pred_ids = ids[jnp.arange(B), seq_length - 1]                   # (B,F)
    pred_vals = values[jnp.arange(B), seq_length - 1]               # (B,F)
    pred_embs = params['emb_table'][pred_ids]                       # (B,F,D)
    lr_w = params['wide_table'][ids.reshape(B, -1)][..., 0]         # (B,E*F)
    lr_vals = values.reshape(B, -1)                                 # (B,E*F)

    inputs = dict(embs=embs, vals=values, times=times, masks=masks,
                  pred_embs=pred_embs, pred_vals=pred_vals,
                  lr_w=lr_w, lr_vals=lr_vals)

    out = jax.block_until_ready(difm_forward(inputs, params))
    ref = jax.block_until_ready(reference(inputs, params))

    assert out.shape == (B,)
    assert np.all(np.isfinite(np.asarray(out)))
    assert np.allclose(np.asarray(out), np.asarray(ref), rtol=2e-2, atol=2e-2), (out, ref)
    print("KERNEL_OK")
</pallas_src>

<mosaic_0001>
module attributes {stable_mosaic.version = 11 : i64} {
  func.func @difm_kernel(%arg0: memref<24x64xf32, #tpu.memory_space<vmem>>, %arg1: memref<2x128xf32, #tpu.memory_space<vmem>>, %arg2: memref<64x128xf32, #tpu.memory_space<vmem>>, %arg3: memref<2x128xf32, #tpu.memory_space<vmem>>) attributes {dimension_semantics = [], scalar_prefetch = 0 : i64, scratch_operands = 0 : i64, tpu.core_type = #tpu.core_type<tc>} {
    %c0 = arith.constant 0 : index
    %c0_0 = arith.constant 0 : index
    %0 = vector.load %arg0[%c0, %c0_0] : memref<24x64xf32, #tpu.memory_space<vmem>>, vector<24x64xf32>
    %c0_1 = arith.constant 0 : index
    %c0_2 = arith.constant 0 : index
    %1 = vector.load %arg1[%c0_1, %c0_2] : memref<2x128xf32, #tpu.memory_space<vmem>>, vector<2x128xf32>
    %2 = vector.extract_strided_slice %0 {offsets = [0, 0], sizes = [16, 64], strides = [1, 1]} : vector<24x64xf32> to vector<16x64xf32>
    %3 = vector.extract_strided_slice %2 {offsets = [0, 0], sizes = [16, 8], strides = [1, 1]} : vector<16x64xf32> to vector<16x8xf32>
    %4 = vector.extract_strided_slice %2 {offsets = [0, 8], sizes = [16, 8], strides = [1, 1]} : vector<16x64xf32> to vector<16x8xf32>
    %5 = vector.extract_strided_slice %2 {offsets = [0, 16], sizes = [16, 8], strides = [1, 1]} : vector<16x64xf32> to vector<16x8xf32>
    %6 = vector.extract_strided_slice %2 {offsets = [0, 24], sizes = [16, 8], strides = [1, 1]} : vector<16x64xf32> to vector<16x8xf32>
    %7 = arith.addf %3, %4 : vector<16x8xf32>
    %8 = arith.addf %7, %5 : vector<16x8xf32>
    %9 = arith.addf %8, %6 : vector<16x8xf32>
    %10 = arith.mulf %3, %3 : vector<16x8xf32>
    %11 = arith.mulf %4, %4 : vector<16x8xf32>
    %12 = arith.addf %10, %11 : vector<16x8xf32>
    %13 = arith.mulf %5, %5 : vector<16x8xf32>
    %14 = arith.addf %12, %13 : vector<16x8xf32>
    %15 = arith.mulf %6, %6 : vector<16x8xf32>
    %16 = arith.addf %14, %15 : vector<16x8xf32>
    %17 = arith.mulf %9, %9 : vector<16x8xf32>
    %18 = arith.subf %17, %16 : vector<16x8xf32>
    %cst = arith.constant 5.000000e-01 : f32
    %19 = vector.broadcast %cst : f32 to vector<16x8xf32>
    %20 = arith.mulf %19, %18 : vector<16x8xf32>
    %21 = vector.extract_strided_slice %2 {offsets = [0, 32], sizes = [16, 1], strides = [1, 1]} : vector<16x64xf32> to vector<16x1xf32>
    %c0_3 = arith.constant 0 : index
    %c0_4 = arith.constant 0 : index
    %22 = vector.load %arg2[%c0_3, %c0_4] : memref<64x128xf32, #tpu.memory_space<vmem>>, vector<1x8xf32>
    %23 = vector.broadcast %21 : vector<16x1xf32> to vector<16x8xf32>
    %24 = vector.broadcast %22 : vector<1x8xf32> to vector<16x8xf32>
    %25 = arith.mulf %23, %24 : vector<16x8xf32>
    %c0_5 = arith.constant 0 : index
    %c8 = arith.constant 8 : index
    %26 = vector.load %arg2[%c0_5, %c8] : memref<64x128xf32, #tpu.memory_space<vmem>>, vector<1x8xf32>
    %27 = vector.broadcast %26 : vector<1x8xf32> to vector<16x8xf32>
    %28 = arith.addf %25, %27 : vector<16x8xf32>
    %29 = tpu.iota {dimensions = array<i32: 1>} : vector<16x8xi32>
    %c0_i32 = arith.constant 0 : i32
    %30 = vector.broadcast %c0_i32 : i32 to vector<16x8xi32>
    %31 = arith.cmpi eq, %29, %30 : vector<16x8xi32>
    %32 = math.sin %28 : vector<16x8xf32>
    %33 = arith.select %31, %28, %32 : vector<16x8xi1>, vector<16x8xf32>
    %34 = tpu.concatenate %20, %33 in 1 : vector<16x8xf32>, vector<16x8xf32> -> vector<16x16xf32>
    %c8_6 = arith.constant 8 : index
    %c0_7 = arith.constant 0 : index
    %35 = vector.load %arg2[%c8_6, %c0_7] : memref<64x128xf32, #tpu.memory_space<vmem>>, vector<16x36xf32>
    %36 = arith.truncf %35 : vector<16x36xf32> to vector<16x36xbf16>
    %c0_8 = arith.constant 0 : index
    %c16 = arith.constant 16 : index
    %37 = vector.load %arg2[%c0_8, %c16] : memref<64x128xf32, #tpu.memory_space<vmem>>, vector<1x36xf32>
    %38 = arith.truncf %34 : vector<16x16xf32> to vector<16x16xbf16>
    %cst_9 = arith.constant dense<0.000000e+00> : vector<16x36xf32>
    %39 = tpu.matmul %38, %36, %cst_9 {dimension_numbers = #tpu.dot_dimension_numbers<[1], [0], [0], [1], [0, 0, 1, 1], [], []>} : vector<16x16xbf16>, vector<16x36xbf16>, vector<16x36xf32> -> vector<16x36xf32>
    %40 = vector.broadcast %37 : vector<1x36xf32> to vector<16x36xf32>
    %41 = arith.addf %39, %40 : vector<16x36xf32>
    %42 = vector.shape_cast %41 : vector<16x36xf32> to vector<2x8x36xf32>
    %43 = vector.extract_strided_slice %42 {offsets = [0, 0, 0], sizes = [2, 8, 12], strides = [1, 1, 1]} : vector<2x8x36xf32> to vector<2x8x12xf32>
    %44 = vector.extract_strided_slice %42 {offsets = [0, 0, 12], sizes = [2, 8, 12], strides = [1, 1, 1]} : vector<2x8x36xf32> to vector<2x8x12xf32>
    %45 = vector.extract_strided_slice %42 {offsets = [0, 0, 24], sizes = [2, 8, 12], strides = [1, 1, 1]} : vector<2x8x36xf32> to vector<2x8x12xf32>
    %46 = vector.extract_strided_slice %1 {offsets = [0, 64], sizes = [2, 8], strides = [1, 1]} : vector<2x128xf32> to vector<2x8xf32>
    %47 = arith.mulf %43, %44 : vector<2x8x12xf32>
    %cst_10 = arith.constant dense<0.000000e+00> : vector<2x8xf32>
    %48 = vector.multi_reduction <add>, %47, %cst_10 [2] : vector<2x8x12xf32> to vector<2x8xf32>
    %cst_11 = arith.constant 0.288675129 : f32
    %49 = vector.broadcast %cst_11 : f32 to vector<2x8xf32>
    %50 = arith.mulf %48, %49 : vector<2x8xf32>
    %cst_12 = arith.constant 1.000000e+00 : f32
    %51 = vector.broadcast %cst_12 : f32 to vector<2x8xf32>
    %52 = arith.subf %51, %46 : vector<2x8xf32>
    %cst_13 = arith.constant 9.99999995E+11 : f32
    %53 = vector.broadcast %cst_13 : f32 to vector<2x8xf32>
    %54 = arith.mulf %52, %53 : vector<2x8xf32>
    %55 = arith.subf %50, %54 : vector<2x8xf32>
    %cst_14 = arith.constant dense<0xFF800000> : vector<2xf32>
    %56 = vector.multi_reduction <maximumf>, %55, %cst_14 [1] : vector<2x8xf32> to vector<2xf32>
    %57 = vector.shape_cast %56 : vector<2xf32> to vector<2x1xf32>
    %58 = vector.broadcast %57 : vector<2x1xf32> to vector<2x8xf32>
    %59 = arith.subf %55, %58 : vector<2x8xf32>
    %60 = math.exp %59 : vector<2x8xf32>
    %cst_15 = arith.constant dense<0.000000e+00> : vector<2xf32>
    %61 = vector.multi_reduction <add>, %60, %cst_15 [1] : vector<2x8xf32> to vector<2xf32>
    %62 = vector.shape_cast %61 : vector<2xf32> to vector<2x1xf32>
    %63 = tpu.reciprocal %62 {approx = true} : vector<2x1xf32> -> vector<2x1xf32>
    %64 = vector.broadcast %63 : vector<2x1xf32> to vector<2x8xf32>
    %65 = arith.mulf %60, %64 : vector<2x8xf32>
    %66 = vector.shape_cast %65 : vector<2x8xf32> to vector<2x8x1xf32>
    %67 = vector.broadcast %66 : vector<2x8x1xf32> to vector<2x8x12xf32>
    %68 = arith.mulf %67, %45 : vector<2x8x12xf32>
    %cst_16 = arith.constant dense<0.000000e+00> : vector<2x12xf32>
    %69 = vector.multi_reduction <add>, %68, %cst_16 [1] : vector<2x8x12xf32> to vector<2x12xf32>
    %70 = vector.extract_strided_slice %0 {offsets = [16, 0], sizes = [8, 64], strides = [1, 1]} : vector<24x64xf32> to vector<8x64xf32>
    %71 = vector.extract_strided_slice %70 {offsets = [0, 0], sizes = [8, 8], strides = [1, 1]} : vector<8x64xf32> to vector<8x8xf32>
    %72 = vector.extract_strided_slice %70 {offsets = [0, 0], sizes = [8, 8], strides = [1, 1]} : vector<8x64xf32> to vector<8x8xf32>
    %73 = vector.extract_strided_slice %70 {offsets = [0, 0], sizes = [8, 8], strides = [1, 1]} : vector<8x64xf32> to vector<8x8xf32>
    %74 = arith.mulf %72, %73 : vector<8x8xf32>
    %75 = vector.extract_strided_slice %70 {offsets = [0, 8], sizes = [8, 8], strides = [1, 1]} : vector<8x64xf32> to vector<8x8xf32>
    %76 = arith.addf %71, %75 : vector<8x8xf32>
    %77 = arith.mulf %75, %75 : vector<8x8xf32>
    %78 = arith.addf %74, %77 : vector<8x8xf32>
    %79 = vector.extract_strided_slice %70 {offsets = [0, 16], sizes = [8, 8], strides = [1, 1]} : vector<8x64xf32> to vector<8x8xf32>
    %80 = arith.addf %76, %79 : vector<8x8xf32>
    %81 = arith.mulf %79, %79 : vector<8x8xf32>
    %82 = arith.addf %78, %81 : vector<8x8xf32>
    %83 = vector.extract_strided_slice %70 {offsets = [0, 24], sizes = [8, 8], strides = [1, 1]} : vector<8x64xf32> to vector<8x8xf32>
    %84 = arith.addf %80, %83 : vector<8x8xf32>
    %85 = arith.mulf %83, %83 : vector<8x8xf32>
    %86 = arith.addf %82, %85 : vector<8x8xf32>
    %87 = vector.extract_strided_slice %70 {offsets = [0, 32], sizes = [8, 8], strides = [1, 1]} : vector<8x64xf32> to vector<8x8xf32>
    %88 = arith.addf %84, %87 : vector<8x8xf32>
    %89 = arith.mulf %87, %87 : vector<8x8xf32>
    %90 = arith.addf %86, %89 : vector<8x8xf32>
    %91 = vector.extract_strided_slice %70 {offsets = [0, 40], sizes = [8, 8], strides = [1, 1]} : vector<8x64xf32> to vector<8x8xf32>
    %92 = arith.addf %88, %91 : vector<8x8xf32>
    %93 = arith.mulf %91, %91 : vector<8x8xf32>
    %94 = arith.addf %90, %93 : vector<8x8xf32>
    %95 = vector.extract_strided_slice %70 {offsets = [0, 48], sizes = [8, 8], strides = [1, 1]} : vector<8x64xf32> to vector<8x8xf32>
    %96 = arith.addf %92, %95 : vector<8x8xf32>
    %97 = arith.mulf %95, %95 : vector<8x8xf32>
    %98 = arith.addf %94, %97 : vector<8x8xf32>
    %99 = vector.extract_strided_slice %70 {offsets = [0, 56], sizes = [8, 8], strides = [1, 1]} : vector<8x64xf32> to vector<8x8xf32>
    %100 = arith.addf %96, %99 : vector<8x8xf32>
    %101 = arith.mulf %99, %99 : vector<8x8xf32>
    %102 = arith.addf %98, %101 : vector<8x8xf32>
    %103 = arith.mulf %100, %100 : vector<8x8xf32>
    %104 = arith.subf %103, %102 : vector<8x8xf32>
    %cst_17 = arith.constant 5.000000e-01 : f32
    %105 = vector.broadcast %cst_17 : f32 to vector<8x8xf32>
    %106 = arith.mulf %105, %104 : vector<8x8xf32>
    %107 = vector.shape_cast %33 : vector<16x8xf32> to vector<2x8x8xf32>
    %cst_18 = arith.constant dense<0.000000e+00> : vector<2x8xf32>
    %108 = vector.multi_reduction <add>, %107, %cst_18 [1] : vector<2x8x8xf32> to vector<2x8xf32>
    %109 = arith.mulf %107, %107 : vector<2x8x8xf32>
    %cst_19 = arith.constant dense<0.000000e+00> : vector<2x8xf32>
    %110 = vector.multi_reduction <add>, %109, %cst_19 [1] : vector<2x8x8xf32> to vector<2x8xf32>
    %111 = arith.mulf %108, %108 : vector<2x8xf32>
    %112 = arith.subf %111, %110 : vector<2x8xf32>
    %cst_20 = arith.constant 5.000000e-01 : f32
    %113 = vector.broadcast %cst_20 : f32 to vector<2x8xf32>
    %114 = arith.mulf %113, %112 : vector<2x8xf32>
    %c24 = arith.constant 24 : index
    %c0_21 = arith.constant 0 : index
    %115 = vector.load %arg2[%c24, %c0_21] : memref<64x128xf32, #tpu.memory_space<vmem>>, vector<8x24xf32>
    %116 = arith.truncf %115 : vector<8x24xf32> to vector<8x24xbf16>
    %117 = arith.truncf %106 : vector<8x8xf32> to vector<8x8xbf16>
    %cst_22 = arith.constant dense<0.000000e+00> : vector<8x24xf32>
    %118 = tpu.matmul %117, %116, %cst_22 {dimension_numbers = #tpu.dot_dimension_numbers<[1], [0], [0], [1], [0, 0, 1, 1], [], []>} : vector<8x8xbf16>, vector<8x24xbf16>, vector<8x24xf32> -> vector<8x24xf32>
    %119 = arith.truncf %114 : vector<2x8xf32> to vector<2x8xbf16>
    %cst_23 = arith.constant dense<0.000000e+00> : vector<2x24xf32>
    %120 = tpu.matmul %119, %116, %cst_23 {dimension_numbers = #tpu.dot_dimension_numbers<[1], [0], [0], [1], [0, 0, 1, 1], [], []>} : vector<2x8xbf16>, vector<8x24xbf16>, vector<2x24xf32> -> vector<2x24xf32>
    %121 = vector.extract_strided_slice %118 {offsets = [0, 0], sizes = [8, 8], strides = [1, 1]} : vector<8x24xf32> to vector<8x8xf32>
    %122 = vector.extract_strided_slice %118 {offsets = [0, 8], sizes = [8, 8], strides = [1, 1]} : vector<8x24xf32> to vector<8x8xf32>
    %123 = arith.mulf %121, %122 : vector<8x8xf32>
    %cst_24 = arith.constant dense<0.000000e+00> : vector<8xf32>
    %124 = vector.multi_reduction <add>, %123, %cst_24 [1] : vector<8x8xf32> to vector<8xf32>
    %125 = vector.shape_cast %124 : vector<8xf32> to vector<8x1xf32>
    %cst_25 = arith.constant 0.353553385 : f32
    %126 = vector.broadcast %cst_25 : f32 to vector<8x1xf32>
    %127 = arith.mulf %125, %126 : vector<8x1xf32>
    %128 = vector.shape_cast %127 : vector<8x1xf32> to vector<2x4xf32>
    %129 = vector.extract_strided_slice %120 {offsets = [0, 0], sizes = [2, 8], strides = [1, 1]} : vector<2x24xf32> to vector<2x8xf32>
    %130 = vector.extract_strided_slice %120 {offsets = [0, 8], sizes = [2, 8], strides = [1, 1]} : vector<2x24xf32> to vector<2x8xf32>
    %131 = arith.mulf %129, %130 : vector<2x8xf32>
    %cst_26 = arith.constant dense<0.000000e+00> : vector<2xf32>
    %132 = vector.multi_reduction <add>, %131, %cst_26 [1] : vector<2x8xf32> to vector<2xf32>
    %133 = vector.shape_cast %132 : vector<2xf32> to vector<2x1xf32>
    %cst_27 = arith.constant 0.353553385 : f32
    %134 = vector.broadcast %cst_27 : f32 to vector<2x1xf32>
    %135 = arith.mulf %133, %134 : vector<2x1xf32>
    %cst_28 = arith.constant dense<0xFF800000> : vector<2xf32>
    %136 = vector.multi_reduction <maximumf>, %128, %cst_28 [1] : vector<2x4xf32> to vector<2xf32>
    %137 = vector.shape_cast %136 : vector<2xf32> to vector<2x1xf32>
    %138 = arith.maximumf %137, %135 : vector<2x1xf32>
    %139 = vector.broadcast %138 : vector<2x1xf32> to vector<2x4xf32>
    %140 = arith.subf %128, %139 : vector<2x4xf32>
    %141 = math.exp %140 : vector<2x4xf32>
    %142 = arith.subf %135, %138 : vector<2x1xf32>
    %143 = math.exp %142 : vector<2x1xf32>
    %cst_29 = arith.constant dense<0.000000e+00> : vector<2xf32>
    %144 = vector.multi_reduction <add>, %141, %cst_29 [1] : vector<2x4xf32> to vector<2xf32>
    %145 = vector.shape_cast %144 : vector<2xf32> to vector<2x1xf32>
    %146 = arith.addf %145, %143 : vector<2x1xf32>
    %147 = tpu.reciprocal %146 {approx = true} : vector<2x1xf32> -> vector<2x1xf32>
    %148 = vector.extract_strided_slice %118 {offsets = [0, 16], sizes = [8, 8], strides = [1, 1]} : vector<8x24xf32> to vector<8x8xf32>
    %149 = vector.shape_cast %148 : vector<8x8xf32> to vector<2x4x8xf32>
    %150 = vector.extract_strided_slice %120 {offsets = [0, 16], sizes = [2, 8], strides = [1, 1]} : vector<2x24xf32> to vector<2x8xf32>
    %151 = vector.shape_cast %141 : vector<2x4xf32> to vector<2x4x1xf32>
    %152 = vector.broadcast %151 : vector<2x4x1xf32> to vector<2x4x8xf32>
    %153 = arith.mulf %152, %149 : vector<2x4x8xf32>
    %cst_30 = arith.constant dense<0.000000e+00> : vector<2x8xf32>
    %154 = vector.multi_reduction <add>, %153, %cst_30 [1] : vector<2x4x8xf32> to vector<2x8xf32>
    %155 = vector.broadcast %143 : vector<2x1xf32> to vector<2x8xf32>
    %156 = arith.mulf %155, %150 : vector<2x8xf32>
    %157 = arith.addf %154, %156 : vector<2x8xf32>
    %158 = vector.broadcast %147 : vector<2x1xf32> to vector<2x8xf32>
    %159 = arith.mulf %157, %158 : vector<2x8xf32>
    %160 = vector.extract_strided_slice %1 {offsets = [0, 72], sizes = [2, 8], strides = [1, 1]} : vector<2x128xf32> to vector<2x8xf32>
    %161 = tpu.concatenate %69, %159, %160 in 1 : vector<2x12xf32>, vector<2x8xf32>, vector<2x8xf32> -> vector<2x28xf32>
    %c32 = arith.constant 32 : index
    %c0_31 = arith.constant 0 : index
    %162 = vector.load %arg2[%c32, %c0_31] : memref<64x128xf32, #tpu.memory_space<vmem>>, vector<28x16xf32>
    %163 = arith.truncf %162 : vector<28x16xf32> to vector<28x16xbf16>
    %164 = arith.truncf %161 : vector<2x28xf32> to vector<2x28xbf16>
    %cst_32 = arith.constant dense<0.000000e+00> : vector<2x16xf32>
    %165 = tpu.matmul %164, %163, %cst_32 {dimension_numbers = #tpu.dot_dimension_numbers<[1], [0], [0], [1], [0, 0, 1, 1], [], []>} : vector<2x28xbf16>, vector<28x16xbf16>, vector<2x16xf32> -> vector<2x16xf32>
    %c0_33 = arith.constant 0 : index
    %c52 = arith.constant 52 : index
    %166 = vector.load %arg2[%c0_33, %c52] : memref<64x128xf32, #tpu.memory_space<vmem>>, vector<1x16xf32>
    %167 = vector.broadcast %166 : vector<1x16xf32> to vector<2x16xf32>
    %168 = arith.addf %165, %167 : vector<2x16xf32>
    %cst_34 = arith.constant 0.000000e+00 : f32
    %169 = vector.broadcast %cst_34 : f32 to vector<2x16xf32>
    %170 = arith.maximumf %168, %169 : vector<2x16xf32>
    %c0_35 = arith.constant 0 : index
    %c68 = arith.constant 68 : index
    %171 = vector.load %arg2[%c0_35, %c68] : memref<64x128xf32, #tpu.memory_space<vmem>>, vector<1x16xf32>
    %172 = vector.broadcast %171 : vector<1x16xf32> to vector<2x16xf32>
    %173 = arith.mulf %170, %172 : vector<2x16xf32>
    %cst_36 = arith.constant dense<0.000000e+00> : vector<2xf32>
    %174 = vector.multi_reduction <add>, %173, %cst_36 [1] : vector<2x16xf32> to vector<2xf32>
    %175 = vector.shape_cast %174 : vector<2xf32> to vector<2x1xf32>
    %176 = vector.extract_strided_slice %1 {offsets = [0, 0], sizes = [2, 32], strides = [1, 1]} : vector<2x128xf32> to vector<2x32xf32>
    %177 = vector.extract_strided_slice %1 {offsets = [0, 32], sizes = [2, 32], strides = [1, 1]} : vector<2x128xf32> to vector<2x32xf32>
    %178 = arith.mulf %176, %177 : vector<2x32xf32>
    %cst_37 = arith.constant dense<0.000000e+00> : vector<2xf32>
    %179 = vector.multi_reduction <add>, %178, %cst_37 [1] : vector<2x32xf32> to vector<2xf32>
    %180 = vector.shape_cast %179 : vector<2xf32> to vector<2x1xf32>
    %181 = arith.addf %175, %180 : vector<2x1xf32>
    %c0_38 = arith.constant 0 : index
    %c84 = arith.constant 84 : index
    %182 = vector.load %arg2[%c0_38, %c84] : memref<64x128xf32, #tpu.memory_space<vmem>>, vector<1x1xf32>
    %183 = vector.broadcast %182 : vector<1x1xf32> to vector<2x1xf32>
    %184 = arith.addf %181, %183 : vector<2x1xf32>
    %cst_39 = arith.constant 0.000000e+00 : f32
    %185 = vector.broadcast %cst_39 : f32 to vector<2x1xf32>
    %186 = arith.subf %185, %184 : vector<2x1xf32>
    %187 = math.exp %186 : vector<2x1xf32>
    %cst_40 = arith.constant 1.000000e+00 : f32
    %188 = vector.broadcast %cst_40 : f32 to vector<2x1xf32>
    %189 = arith.addf %188, %187 : vector<2x1xf32>
    %cst_41 = arith.constant 1.000000e+00 : f32
    %190 = vector.broadcast %cst_41 : f32 to vector<2x1xf32>
    %191 = arith.divf %190, %189 : vector<2x1xf32>
    %192 = vector.shape_cast %191 : vector<2x1xf32> to vector<2x1xf32>
    %193 = vector.broadcast %192 : vector<2x1xf32> to vector<2x128xf32>
    %c0_42 = arith.constant 0 : index
    %c0_43 = arith.constant 0 : index
    %194 = vector.load %arg3[%c0_42, %c0_43] : memref<2x128xf32, #tpu.memory_space<vmem>>, vector<2x128xf32>
    tpu.vector_store %arg3[%c0_42, %c0_43], %193 {strides = array<i32>} : memref<2x128xf32, #tpu.memory_space<vmem>>, vector<2x128xf32>,
    return
  }
}

</mosaic_0001>

<bundles_post_ra>
// kernel: _difm_call.1
= control target key start
LH: loop header
LB: loop body
LE: loop exit
PB: predicated region body
PF: predicated region fallthrough
CT: control target
= control target key end

     0   :  { %v1115_v0 = vmov 32   ;;  %s1116_s18 = smov 120   ;;  %s1117_s19 = smov 112   ;;  %v1123_v33 = vmov 683565275   ;;  %s1497_s0 = inlined_call_operand.vmem [shape: f32[24,64], index: 0, kind: input, shape index: {}]   ;;  %s1498_s2 = inlined_call_operand.vmem [shape: f32[64,128], index: 2, kind: input, shape index: {}]   ;;  %s1499_s1 = inlined_call_operand.vmem [shape: f32[2,128], index: 1, kind: input, shape index: {}]   ;;  %s1500_s3 = inlined_call_operand.vmem [shape: f32[2,128], index: 3, kind: output, shape index: {}]  }
   0x1   :  { %1080 = vset.pattern.permute.xlu0 %v1115_v0  ;;  %v1163_v1 = vld [vmem:[%s1497_s0] sm:$0xff]  ;;  %v1174_v3 = vld [vmem:[%s1497_s0 + $0x8] sm:$0xff]  ;;  %s1118_s20 = smov 104   ;;  %v1212_v6 = vld [vmem:[%s1497_s0 + $0x10] sm:$0xff]  ;;  %s1119_s0 = smov 96  }
   0x2   :  { %81 = vperm.xlu0 %1080, %v1163_v1   ;;  %v1169_v2 = vld [vmem:[%s1498_s2] ss:$0 sm:$0xff]  ;;  %v1189_v4 = vmul.f32 %v1163_v1, %v1163_v1  ;;  %v1195_v5 = vmul.f32 %v1174_v3, %v1174_v3  ;;  %v1220_v7 = vmul.f32 %v1212_v6, %v1212_v6  ;;  %s1120_s23 = smov 88   ;;  %s1121_s24 = smov 80   ;;  %v1124_v35 = vmov 2475754826  }
   0x3   :  { %95 = vrot.lane.b32.xlu1 %v1169_v2, %s1116_s18  ;;  %s1122_s25 = smov 72   ;;  %v1125_v38 = vmov 2131351028   ;;  %v1126_v40 = vmov 2102212464   ;;  %s1131_s5 = smov 8  }
   0x4   :  { %v1127_v42 = vmov 920167782   ;;  %v1128_v49 = vmov 1326507024   ;;  %s1132_s6 = smov 116   ;;  %s1138_s21 = smov 60  }
   0x6   :  { %85 = vperm.xlu0 %1080, %v1174_v3  }
   0x7   :  { %21 = vrot.lane.b32.xlu1 %v1163_v1, %s1116_s18 }
   0xa   :  { %23 = vrot.lane.b32.xlu0 %v1174_v3, %s1116_s18 }
   0xb   :  { %29 = vrot.lane.b32.xlu1 %v1163_v1, %s1117_s19 }
   0xe   :  { %31 = vrot.lane.b32.xlu0 %v1174_v3, %s1117_s19 }
   0xf   :  { %49 = vrot.lane.b32.xlu1 %v1189_v4, %s1116_s18 }
  0x12   :  { %51 = vrot.lane.b32.xlu0 %v1195_v5, %s1116_s18 }
  0x13   :  { %37 = vrot.lane.b32.xlu1 %v1163_v1, %s1118_s20 }
  0x16   :  { %39 = vrot.lane.b32.xlu0 %v1174_v3, %s1118_s20 }
  0x17   :  { %57 = vrot.lane.b32.xlu1 %v1189_v4, %s1117_s19 }
  0x1a   :  { %59 = vrot.lane.b32.xlu0 %v1195_v5, %s1117_s19 }
  0x1b   :  { %65 = vrot.lane.b32.xlu1 %v1189_v4, %s1118_s20 }
  0x1e   :  { %67 = vrot.lane.b32.xlu0 %v1195_v5, %s1118_s20 }
  0x1f   :  { %522 = vrot.lane.b32.xlu1 %v1212_v6, %s1116_s18 }
  0x22   :  { %531 = vrot.lane.b32.xlu0 %v1212_v6, %s1117_s19 }
  0x23   :  { %527 = vrot.lane.b32.xlu1 %v1220_v7, %s1116_s18 }
  0x26   :  { %539 = vrot.lane.b32.xlu0 %v1212_v6, %s1118_s20 }
  0x27   :  { %535 = vrot.lane.b32.xlu1 %v1220_v7, %s1117_s19 }
  0x2a   :  { %547 = vrot.lane.b32.xlu0 %v1212_v6, %s1119_s0 }
  0x2b   :  { %543 = vrot.lane.b32.xlu1 %v1220_v7, %s1118_s20 }
  0x2f   :  { %551 = vrot.lane.b32.xlu1 %v1220_v7, %s1119_s0 }
  0x33   :  { %559 = vrot.lane.b32.xlu1 %v1220_v7, %s1120_s23 }
  0x37   :  { %567 = vrot.lane.b32.xlu1 %v1220_v7, %s1121_s24 }
  0x3b   :  { %575 = vrot.lane.b32.xlu1 %v1220_v7, %s1122_s25 }
  0x75   :  { %v96_v9 = vpop.permute.xlu1 %95 }
  0x81   :  { %v82_v8 = vpop.permute.xlu0 %81 }
  0x82   :  { %v92_v10 = vmul.f32 %v1169_v2, %v82_v8 }
  0x84   :  { %v1243_v11 = vadd.f32 %v96_v9, %v92_v10 }
  0x85   :  { %v86_v12 = vpop.permute.xlu0 %85 }
  0x86   :  { %v103_v13 = vand.u32 2147483647, %v1243_v11  ;;  %v106_v14 = vand.u32 2139095040, %v1243_v11  ;;  %v93_v15 = vmul.f32 %v1169_v2, %v86_v12  ;;  %vm105_vm14 = vcmp.lt.s32.totalorder %v1243_v11, 0 }
  0x88   :  { %v107_v16 = vshrl.u32 %v106_v14, 23  ;;  %v1248_v17 = vadd.f32 %v96_v9, %v93_v15  ;;  %v110_v18 = vand.u32 8388607, %v103_v13  ;;  %vm104_vm15 = vcmp.le.f32.partialorder %v103_v13, 0.7853982 }
  0x8a   :  { %v999_v19 = vadd.s32 4294967169, %v107_v16  ;;  %v210_v20 = vand.u32 2139095040, %v1248_v17  ;;  %v207_v21 = vand.u32 2147483647, %v1248_v17  ;;  %v111_v24 = vor.u32 8388608, %v110_v18 }
  0x8c   :  { %v113_v22 = vadd.s32 1, %v999_v19  ;;  %v211_v23 = vshrl.u32 %v210_v20, 23  ;;  %v214_v25 = vand.u32 8388607, %v207_v21  ;;  %v1256_v30 = vshll.u32 %v111_v24, 8 }
  0x8e   :  { %vm114_vm0 = vcmp.gt.s32.totalorder %v113_v22, 0  ;;  %v1003_v26 = vadd.s32 4294967169, %v211_v23  ;;  %v215_v31 = vor.u32 8388608, %v214_v25 }
  0x8f   :  { %v115_v27 = vsel %vm114_vm0, %v113_v22, 0  ;;  %vm209_vm0 = vcmp.lt.s32.totalorder %v1248_v17, 0 }
  0x90   :  { %v116_v28 = vshrl.u32 %v115_v27, 5  ;;  %v117_v29 = vand.u32 31, %v115_v27  ;;  %v217_v37 = vadd.s32 1, %v1003_v26  ;;  %v255_v24 = vshll.u32 %v215_v31, 8 }
  0x92   :  { %v118_v32 = vsub.s32 32, %v117_v29  ;;  %v120_v34 = vshll.u32 %v1123_v33, %v117_v29  ;;  %v123_v36 = vshll.u32 %v1124_v35, %v117_v29  ;;  %v126_v39 = vshll.u32 %v1125_v38, %v117_v29 }
  0x93   :  { %v129_v41 = vshll.u32 %v1126_v40, %v117_v29  ;;  %v132_v43 = vshll.u32 %v1127_v42, %v117_v29  ;;  %vm135_vm1 = vcmp.lt.s32.totalorder %v116_v28, 1  ;;  %vm136_vm2 = vcmp.lt.s32.totalorder %v116_v28, 2 }
  0x94   :  { %v121_v44 = vshrl.u32 %v1124_v35, %v118_v32  ;;  %v124_v45 = vshrl.u32 %v1125_v38, %v118_v32  ;;  %v127_v46 = vshrl.u32 %v1126_v40, %v118_v32  ;;  %v119_v47 = vshrl.u32 %v1123_v33, %v118_v32 }
  0x95   :  { %v130_v48 = vshrl.u32 %v1127_v42, %v118_v32  ;;  %v133_v50 = vshrl.u32 %v1128_v49, %v118_v32  ;;  %vm137_vm3 = vcmp.lt.s32.totalorder %v116_v28, 3  ;;  %vm218_vm4 = vcmp.gt.s32.totalorder %v217_v37, 0 }
  0x96   :  { %v122_v51 = vor.u32 %v121_v44, %v120_v34  ;;  %v125_v52 = vor.u32 %v124_v45, %v123_v36  ;;  %v128_v53 = vor.u32 %v127_v46, %v126_v39  ;;  %vm138_vm5 = vcmp.lt.s32.totalorder %v116_v28, 4 }
  0x97   :  { %v131_v54 = vor.u32 %v130_v48, %v129_v41  ;;  %v134_v55 = vor.u32 %v133_v50, %v132_v43  ;;  %v219_v56 = vsel %vm218_vm4, %v217_v37, 0 }
  0x98   :  { %v139_v57 = vsel %vm135_vm1, %v119_v47, %v122_v51  ;;  %v140_v58 = vsel %vm138_vm5, %v128_v53, 2102212464  ;;  %v143_v59 = vsel %vm135_vm1, %v122_v51, %v125_v52  ;;  %v147_v60 = vsel %vm135_vm1, %v125_v52, %v128_v53 }
  0x99   :  { %v141_v61 = vsel %vm137_vm3, %v125_v52, %v140_v58  ;;  %v144_v62 = vsel %vm138_vm5, %v131_v54, 920167782  ;;  %v148_v63 = vsel %vm138_vm5, %v134_v55, 1326507024  ;;  %v220_v0 = vshrl.u32 %v219_v56, 5 }
  0x9a   :  { %v142_v8 = vsel %vm136_vm2, %v139_v57, %v141_v61  ;;  %v145_v9 = vsel %vm137_vm3, %v128_v53, %v144_v62  ;;  %v149_v10 = vsel %vm137_vm3, %v131_v54, %v148_v63  ;;  %v221_v12 = vand.u32 31, %v219_v56 }
  0x9b   :  { %v146_v14 = vsel %vm136_vm2, %v143_v59, %v145_v9  ;;  %v150_v15 = vsel %vm136_vm2, %v147_v60, %v149_v10  ;;  %v158_v22 = vmul.u32 %v1256_v30, %v142_v8  ;;  %vm242_vm6 = vcmp.lt.s32.totalorder %v220_v0, 4 }
  0x9c   :  { %v1270_v16 = vmul.u32.u64.low %v1256_v30, %v150_v15  ;;  %v1271_v18 = vmul.u32.u64.high %v1256_v30, %v150_v15, %v1270_v16  ;;  %v1274_v19 = vmul.u32.u64.low %v1256_v30, %v146_v14  ;;  %v1275_v20 = vmul.u32.u64.high %v1256_v30, %v146_v14, %v1274_v19 }
  0x9d   :  { %v222_v23 = vsub.s32 32, %v221_v12  ;;  %v233_v25 = vshll.u32 %v1126_v40, %v221_v12  ;;  %v236_v26 = vshll.u32 %v1127_v42, %v221_v12  ;;  %v224_v27 = vshll.u32 %v1123_v33, %v221_v12 }
  0x9e   :  { %v227_v34 = vshll.u32 %v1124_v35, %v221_v12  ;;  %vm160_vm7 = vc.u32 %v1271_v18, %v1274_v19  ;;  %v161_v36 = vadd.s32 1, %v1275_v20  ;;  %v230_v39 = vshll.u32 %v1125_v38, %v221_v12 }
  0x9f   :  { %v234_v28 = vshrl.u32 %v1127_v42, %v222_v23  ;;  %v237_v29 = vshrl.u32 %v1128_v49, %v222_v23  ;;  %v225_v32 = vshrl.u32 %v1124_v35, %v222_v23  ;;  %v228_v37 = vshrl.u32 %v1125_v38, %v222_v23 }
  0xa0   :  { %v231_v31 = vshrl.u32 %v1126_v40, %v222_v23  ;;  %v162_v44 = vsel %vm160_vm7, %v161_v36, %v1275_v20  ;;  %vm239_vm8 = vcmp.lt.s32.totalorder %v220_v0, 1  ;;  %vm241_vm9 = vcmp.lt.s32.totalorder %v220_v0, 3 }
  0xa1   :  { %v235_v41 = vor.u32 %v234_v28, %v233_v25  ;;  %v238_v30 = vor.u32 %v237_v29, %v236_v26  ;;  %v226_v43 = vor.u32 %v225_v32, %v224_v27  ;;  %v229_v45 = vor.u32 %v228_v37, %v227_v34 }
  0xa2   :  { %v163_v42 = vadd.s32 %v162_v44, %v158_v22  ;;  %v232_v47 = vor.u32 %v231_v31, %v230_v39  ;;  %v223_v48 = vshrl.u32 %v1123_v33, %v222_v23  ;;  %vm240_vm10 = vcmp.lt.s32.totalorder %v220_v0, 2 }
  0xa3   :  { %v248_v46 = vsel %vm242_vm6, %v235_v41, 920167782  ;;  %v252_v35 = vsel %vm242_vm6, %v238_v30, 1326507024  ;;  %v247_v49 = vsel %vm239_vm8, %v226_v43, %v229_v45  ;;  %v159_v0 = vadd.s32 %v1274_v19, %v1271_v18 }
  0xa4   :  { %v253_v38 = vsel %vm241_vm9, %v235_v41, %v252_v35  ;;  %v164_v50 = vadd.s32 536870912, %v163_v42  ;;  %v244_v40 = vsel %vm242_vm6, %v232_v47, 2102212464  ;;  %v249_v51 = vsel %vm241_vm9, %v232_v47, %v248_v46 }
  0xa5   :  { %v251_v52 = vsel %vm239_vm8, %v229_v45, %v232_v47  ;;  %v243_v53 = vsel %vm239_vm8, %v223_v48, %v226_v43  ;;  %v250_v54 = vsel %vm240_vm10, %v247_v49, %v249_v51  ;;  %v245_v57 = vsel %vm241_vm9, %v229_v45, %v244_v40 }
  0xa6   :  { %v254_v55 = vsel %vm240_vm10, %v251_v52, %v253_v38  ;;  %v165_v56 = vshrl.u32 %v164_v50, 30  ;;  %v1296_v59 = vmul.u32.u64.low %v255_v24, %v250_v54  ;;  %v1297_v60 = vmul.u32.u64.high %v255_v24, %v250_v54, %v1296_v59 }
  0xa7   :  { %v1293_v58 = vmul.u32.u64.low %v255_v24, %v254_v55  ;;  %v1294_v33 = vmul.u32.u64.high %v255_v24, %v254_v55, %v1293_v58  ;;  %v246_v62 = vsel %vm240_vm10, %v243_v53, %v245_v57  ;;  %vm1316_vm1 = vcmp.le.f32.partialorder %v207_v21, 0.7853982 }
  0xa8   :  { %v166_v61 = vshll.u32 %v165_v56, 30  ;;  %v265_v8 = vadd.s32 1, %v1297_v60  ;;  %v262_v10 = vmul.u32 %v255_v24, %v246_v62  ;;  %v189_v46 = vsub.s32 4, %v165_v56 }
  0xa9   :  { %vm264_vm11 = vc.u32 %v1294_v33, %v1296_v59  ;;  %v263_v19 = vadd.s32 %v1296_v59, %v1294_v33  ;;  %vm195_vm6 = vweird.f32 %v1243_v11  ;;  %vm321_vm7 = vcmask 64512  }
  0xaa   :  { %v167_v63 = vsub.s32 %v163_v42, %v166_v61  ;;  %v266_v12 = vsel %vm264_vm11, %v265_v8, %v1297_v60  ;;  %v190_v38 = vsel %vm105_vm14, %v189_v46, %v165_v56  ;;  %v100_v60 = vlaneseq }
  0xab   :  { %v267_v15 = vadd.s32 %v266_v12, %v262_v10  ;;  %v192_v53 = vsel %vm104_vm15, 0, %v190_v38  ;;  %vm1130_vm9 = vmmov 0  }
  0xac   :  { %v169_v9 = vsub.s32 0, %v167_v63  ;;  %v196_v58 = vadd.s32 3, %v192_v53  ;;  %v1312_v8 = vand.u32 127, %v100_v60 }
  0xad   :  { %v268_v20 = vadd.s32 536870912, %v267_v15 }
  0xae   :  { %v1000_v14 = vmin.u32 %v169_v9, %v167_v63  ;;  %vm102_vm4 = vcmp.eq.s32.totalorder %v1312_v8, 0 }
  0xaf   :  { %v269_v23 = vshrl.u32 %v268_v20, 30 }
  0xb0   :  { %v171_v16 = vclz %v1000_v14 }
  0xb1   :  { %v270_v26 = vshll.u32 %v269_v23, 30  ;;  %v293_v61 = vsub.s32 4, %v269_v23 }
  0xb2   :  { %v1001_v22 = vadd.s32 4294967294, %v171_v16 }
  0xb3   :  { %v271_v29 = vsub.s32 %v267_v15, %v270_v26  ;;  %v294_v9 = vsel %vm209_vm0, %v293_v61, %v269_v23 }
  0xb4   :  { %vm1002_vm12 = vcmp.lt.s32.totalorder %v1001_v22, 0  ;;  %v296_v23 = vsel %vm1316_vm1, 0, %v294_v9 }
  0xb5   :  { %v174_v25 = vsel %vm1002_vm12, 0, %v1001_v22  ;;  %v273_v36 = vsub.s32 0, %v271_v29  ;;  %vm299_vm12 = vweird.f32 %v1248_v17 }
  0xb6   :  { %v175_v27 = vsub.s32 32, %v174_v25  ;;  %v179_v28 = vsub.s32 4294967266, %v174_v25  ;;  %v176_v32 = vshll.u32 %v167_v63, %v174_v25  ;;  %v197_v63 = vand.u32 3, %v196_v58 }
  0xb7   :  { %v1004_v41 = vmin.u32 %v273_v36, %v271_v29  ;;  %v324_v36 = vld [vmem:[%s1498_s2 + $0x8] sm:$0xff] }
  0xb8   :  { %v177_v34 = vshrl.u32 %v159_v0, %v175_v27  ;;  %v180_v24 = vadd.s32 127, %v179_v28  ;;  %vm202_vm2 = vcmp.eq.s32.totalorder %v197_v63, 2  ;;  %vm199_vm3 = vcmp.eq.s32.totalorder %v197_v63, 0 }
  0xb9   :  { %v275_v43 = vclz %v1004_v41  ;;  %vm198_vm5 = vcmp.lt.s32.totalorder %v197_v63, 2  ;;  %v300_v0 = vadd.s32 3, %v296_v23 }
  0xba   :  { %v178_v37 = vor.u32 %v177_v34, %v176_v32  ;;  %v181_v39 = vshll.u32 %v180_v24, 23 }
  0xbb   :  { %v1005_v45 = vadd.s32 4294967294, %v275_v43  ;;  %v301_v34 = vand.u32 3, %v300_v0  ;;  %v1129_v43 = vmov 0.0  }
  0xbc   :  { %v182_v30 = vor.u32 4788187, %v181_v39  ;;  %v185_v44 = vcvt.s32.f32 %v178_v37  ;;  %v325_v37 = vld [vmem:[%s1498_s2 + $0x10] sm:$0xff]  ;;  %1021 = vmatprep.subr.bf16.mxu0 %v1129_v43  ;;  %1027 = vmatprep.subr.bf16.mxu1 %v1129_v43 }
  0xbd   :  { %vm1006_vm13 = vcmp.lt.s32.totalorder %v1005_v45, 0  ;;  %vm306_vm8 = vcmp.eq.s32.totalorder %v301_v34, 2  ;;  %1023 = vmatprep.mubr.msk.bf16.mxu0 %vm1130_vm9, %v1129_v43  ;;  %1029 = vmatprep.mubr.msk.bf16.mxu1 %vm1130_vm9, %v1129_v43  ;;  %vm303_vm10 = vcmp.eq.s32.totalorder %v301_v34, 0  ;;  %vm302_vm11 = vcmp.lt.s32.totalorder %v301_v34, 2 }
  0xbe   :  { %v183_v31 = vand.u32 2147483647, %v182_v30  ;;  %v278_v18 = vsel %vm1006_vm13, 0, %v1005_v45  ;;  %v326_v30 = vpack.c.bf16 %v325_v37, %v324_v36  ;;  %vm624_vm13 = vcmask 1043456  }
  0xbf   :  { %v279_v47 = vsub.s32 32, %v278_v18  ;;  %v283_v48 = vsub.s32 4294967266, %v278_v18  ;;  %v280_v40 = vshll.u32 %v271_v29, %v278_v18 }
  0xc0   :  { %v186_v42 = vmul.f32 %v185_v44, %v183_v31  ;;  %1022 = vmatpush3.bf16.msra.mxu0 %v326_v30 }
  0xc1   :  { %v281_v51 = vshrl.u32 %v263_v19, %v279_v47  ;;  %v284_v52 = vadd.s32 127, %v283_v48  ;;  %1033 = vmatprep.subr.bf16.mxu0 %v1129_v43  ;;  %v618_v48 = vld [vmem:[%s1498_s2 + $0x18] sm:$0xff] }
  0xc2   :  { %v187_v35 = vxor.u32 2147483648, %v186_v42  ;;  %v619_v38 = vpack.c.bf16 %v618_v48, %v618_v48 }
  0xc3   :  { %v282_v54 = vor.u32 %v281_v51, %v280_v40  ;;  %v285_v55 = vshll.u32 %v284_v52, 23 }
  0xc4   :  { %v188_v49 = vsel %vm105_vm14, %v187_v35, %v186_v42  ;;  %v1352_v53 = vsel %vm624_vm13, %v619_v38, 0  ;;  %vm434_vm14 = vcmask 1041409  }
  0xc5   :  { %v191_v50 = vsel %vm104_vm15, %v1243_v11, %v188_v49  ;;  %v286_v57 = vor.u32 4788187, %v285_v55  ;;  %v289_v59 = vcvt.s32.f32 %v282_v54  ;;  %1028 = vmatpush3.bf16.msra.mxu1 %v1352_v53  ;;  %vm331_vm15 = vcmask 130048  }
  0xc6   :  { %1089 = vcosq.f32 %v191_v50  ;;  %1039 = vmatprep.subr.bf16.mxu1 %v1129_v43 }
  0xc7   :  { %1091 = vsinq.f32 %v191_v50  ;;  %v287_v33 = vand.u32 2147483647, %v286_v57 }
  0xc9   :  { %v290_v62 = vmul.f32 %v289_v59, %v287_v33 }
  0xcb   :  { %v291_v13 = vxor.u32 2147483648, %v290_v62 }
  0xcd   :  { %v292_v15 = vsel %vm209_vm0, %v291_v13, %v290_v62  ;;  %vm386_vm0 = vcmask 97280  }
  0xce   :  { %v295_v20 = vsel %vm1316_vm1, %v1248_v17, %v292_v15  ;;  %vm437_vm1 = vcmask 58368  }
  0xcf   :  { %1093 = vcosq.f32 %v295_v20 }
  0xd0   :  { %v1090_v56 = vpop.eup %1089  ;;  %1095 = vsinq.f32 %v295_v20 }
  0xd1   :  { %v1092_v10 = vpop.eup %1091  ;;  %v203_v12 = vxor.u32 2147483648, %v1090_v56 }
  0xd2   :  { %v200_v16 = vxor.u32 2147483648, %v1092_v10 }
  0xd3   :  { %v204_v22 = vsel %vm202_vm2, %v203_v12, %v1092_v10  ;;  %vm770_vm2 = vcmask 25600  }
  0xd4   :  { %v201_v21 = vsel %vm199_vm3, %v1090_v56, %v200_v16  ;;  %vm851_vm3 = vcmask 191616  }
  0xd5   :  { %v205_v25 = vsel %vm198_vm5, %v201_v21, %v204_v22  ;;  %vm919_vm5 = vcmask 1045504  }
  0xd6   :  { %v206_v26 = vsel %vm195_vm6, nan, %v205_v25  ;;  %vm897_vm6 = vcmask 162816  }
  0xd7   :  { %v311_v27 = vsel %vm102_vm4, %v1243_v11, %v206_v26 }
  0xd8   :  { %v582_v28 = vsel %vm321_vm7, %v311_v27, 0.0  ;;  %v596_v29 = vmul.f32 %v311_v27, %v311_v27 }
  0xd9   :  { %v583_v32 = vrot.slane %v582_v28, 4  ;;  %v1094_v11 = vpop.eup %1093 }
  0xda   :  { %v598_v24 = vsel %vm321_vm7, %v596_v29, 0.0  ;;  %v1096_v45 = vpop.eup %1095  ;;  %v307_v42 = vxor.u32 2147483648, %v1094_v11 }
  0xdb   :  { %v584_v39 = vadd.f32 %v583_v32, %v582_v28  ;;  %v599_v41 = vrot.slane %v598_v24, 4  ;;  %v304_v46 = vxor.u32 2147483648, %v1096_v45 }
  0xdc   :  { %v308_v19 = vsel %vm306_vm8, %v307_v42, %v1096_v45  ;;  %vm976_vm8 = vcmask 254976  }
  0xdd   :  { %v585_v31 = vrot.slane %v584_v39, 2  ;;  %v600_v44 = vadd.f32 %v599_v41, %v598_v24  ;;  %v305_v47 = vsel %vm303_vm10, %v1094_v11, %v304_v46  ;;  %v22_v24 = vpop.permute.xlu1 %21 }
  0xde   :  { %v309_v49 = vsel %vm302_vm11, %v305_v47, %v308_v19 }
  0xdf   :  { %v586_v35 = vadd.f32 %v585_v31, %v584_v39  ;;  %v601_v18 = vrot.slane %v600_v44, 2  ;;  %v310_v50 = vsel %vm299_vm12, nan, %v309_v49  ;;  %v24_v39 = vpop.permute.xlu0 %23 }
  0xe0   :  { %v312_v52 = vsel %vm102_vm4, %v1248_v17, %v310_v50  ;;  %v28_v19 = vadd.f32 %v24_v39, %v1174_v3  ;;  %vm505_vm4 = vcmask 294080  }
  0xe1   :  { %v587_v40 = vrot.slane %v586_v35, 1  ;;  %v602_v51 = vadd.f32 %v601_v18, %v600_v44  ;;  %v1081_v54 = vpack.i.bf16 %v312_v52, %v311_v27  ;;  %v589_v55 = vsel %vm321_vm7, %v312_v52, 0.0  ;;  %v30_v36 = vpop.permute.xlu1 %29 }
  0xe2   :  { %v590_v57 = vrot.slane %v589_v55, 4  ;;  %v597_v58 = vmul.f32 %v312_v52, %v312_v52  ;;  %v27_v18 = vadd.f32 %v22_v24, %v1163_v1 }
  0xe3   :  { %v588_v33 = vadd.f32 %v587_v40, %v586_v35  ;;  %v603_v59 = vrot.slane %v602_v51, 1  ;;  %1082 = vrot.lane.b32.xlu0 %v1081_v54, %s1131_s5  ;;  %v32_v30 = vpop.permute.xlu0 %31 }
  0xe4   :  { %v591_v61 = vadd.f32 %v590_v57, %v589_v55  ;;  %v605_v62 = vsel %vm321_vm7, %v597_v58, 0.0  ;;  %v35_v49 = vadd.f32 %v30_v36, %v27_v18  ;;  %v36_v38 = vadd.f32 %v32_v30, %v28_v19 }
  0xe5   :  { %v606_v63 = vrot.slane %v605_v62, 4  ;;  %v604_v13 = vadd.f32 %v603_v59, %v602_v51  ;;  %v612_v56 = vmul.f32 %v588_v33, %v588_v33  ;;  %v50_v37 = vpop.permute.xlu1 %49 }
  0xe6   :  { %v592_v17 = vrot.slane %v591_v61, 2  ;;  %v55_v50 = vadd.f32 %v50_v37, %v1189_v4 }
  0xe7   :  { %v607_v9 = vadd.f32 %v606_v63, %v605_v62  ;;  %555 = vrot.lane.b32.xlu0 %v1212_v6, %s1120_s23  ;;  %v614_v15 = vsub.f32 %v612_v56, %v604_v13  ;;  %v52_v31 = vpop.permute.xlu0 %51 }
  0xe8   :  { %v593_v10 = vadd.f32 %v592_v17, %v591_v61  ;;  %v56_v40 = vadd.f32 %v52_v31, %v1195_v5 }
  0xe9   :  { %v608_v12 = vrot.slane %v607_v9, 2  ;;  %v616_v21 = vmul.f32 0.5, %v614_v15  ;;  %v38_v41 = vpop.permute.xlu1 %37 }
  0xea   :  { %v594_v14 = vrot.slane %v593_v10, 1  ;;  %v43_v52 = vadd.f32 %v38_v41, %v35_v49 }
  0xeb   :  { %v609_v16 = vadd.f32 %v608_v12, %v607_v9  ;;  %563 = vrot.lane.b32.xlu0 %v1212_v6, %s1121_s24  ;;  %v668_v0 = vpack.c.bf16 %v616_v21, %v616_v21  ;;  %v40_v45 = vpop.permute.xlu0 %39 }
  0xec   :  { %v595_v20 = vadd.f32 %v594_v14, %v593_v10  ;;  %v44_v54 = vadd.f32 %v40_v45, %v36_v38  ;;  %v73_v59 = vmul.f32 %v43_v52, %v43_v52 }
  0xed   :  { %v610_v22 = vrot.slane %v609_v16, 1  ;;  %v672_v29 = vunpack.c.l.b16 %v668_v0  ;;  %v58_v11 = vpop.permute.xlu1 %57 }
  0xee   :  { %v613_v23 = vmul.f32 %v595_v20, %v595_v20  ;;  %v63_v55 = vadd.f32 %v58_v11, %v55_v50  ;;  %v74_v1 = vmul.f32 %v44_v54, %v44_v54 }
  0xef   :  { %v611_v25 = vadd.f32 %v610_v22, %v609_v16  ;;  %571 = vrot.lane.b32.xlu0 %v1212_v6, %s1122_s25  ;;  %v60_v46 = vpop.permute.xlu0 %59 }
  0xf0   :  { %v64_v57 = vadd.f32 %v60_v46, %v56_v40 }
  0xf1   :  { %v615_v26 = vsub.f32 %v613_v23, %v611_v25  ;;  %v66_v44 = vpop.permute.xlu1 %65 }
  0xf2   :  { %v71_v61 = vadd.f32 %v66_v44, %v63_v55 }
  0xf3   :  { %v617_v27 = vmul.f32 0.5, %v615_v26  ;;  %328 = vrot.lane.b32.xlu0 %v1169_v2, %s1117_s19  ;;  %v68_v35 = vpop.permute.xlu0 %67  ;;  %s1137_s19 = smov 124  }
  0xf4   :  { %v72_v3 = vadd.f32 %v68_v35, %v64_v57  ;;  %v75_v4 = vsub.f32 %v73_v59, %v71_v61  ;;  %v1403_v57 = vld [vmem:[%s1499_s1] sm:$0x3] }
  0xf5   :  { %v669_v28 = vpack.c.bf16 %v617_v27, %v617_v27  ;;  %v523_v42 = vpop.permute.xlu1 %522  ;;  %v395_v59 = vsub.f32 1.0, %v1403_v57 }
  0xf6   :  { %v525_v62 = vadd.f32 %v523_v42, %v1212_v6  ;;  %v76_v56 = vsub.f32 %v74_v1, %v72_v3  ;;  %v77_v14 = vmul.f32 0.5, %v75_v4 }
  0xf7   :  { %v673_v32 = vunpack.c.l.b16 %v669_v28  ;;  %v532_v48 = vpop.permute.xlu0 %531  ;;  %v396_v61 = vmul.f32 1e+12, %v395_v59 }
  0xf8   :  { %v534_v5 = vadd.f32 %v532_v48, %v525_v62  ;;  %v78_v15 = vmul.f32 0.5, %v76_v56 }
  0xf9   :  { %v1367_v34 = vsel %vm434_vm14, %v673_v32, %v672_v29  ;;  %v528_v2 = vpop.permute.xlu1 %527 }
  0xfa   :  { %v530_v33 = vadd.f32 %v528_v2, %v1220_v7  ;;  %v675_v39 = vpack.c.b16 %v1367_v34, %v1367_v34 }
  0xfb   :  { %v540_v58 = vpop.permute.xlu0 %539 }
  0xfc   :  { %v542_v7 = vadd.f32 %v540_v58, %v534_v5  ;;  %v399_v58 = vshrl.u32 %v100_v60, 7  ;;  %v1133_v60 = vmov 0  }
  0xfd   :  { %v536_v47 = vpop.permute.xlu1 %535  ;;  %1087 = vset.pattern.permute.xlu0 %v1133_v60  ;;  %1086 = vset.pattern.permute.xlu1 %v1133_v60 }
  0xfe   :  { %v538_v17 = vadd.f32 %v536_v47, %v530_v33  ;;  %v1407_v3 = vsub.s32 1, %v399_v58  ;;  %v1414_v56 = vsub.s32 0, %v399_v58 }
  0xff   :  { %v548_v13 = vpop.permute.xlu0 %547 }
 0x100   :  { %v550_v0 = vadd.f32 %v548_v13, %v542_v7  ;;  %v409_v13 = vrot.slane %v396_v61, %v1407_v3  ;;  %v401_v5 = vrot.slane %v396_v61, %v1414_v56 }
 0x101   :  { %v544_v51 = vpop.permute.xlu1 %543 }
 0x102   :  { %v546_v9 = vadd.f32 %v544_v51, %v538_v17 }
 0x105   :  { %v552_v63 = vpop.permute.xlu1 %551 }
 0x106   :  { %v554_v22 = vadd.f32 %v552_v63, %v546_v9 }
 0x109   :  { %v560_v10 = vpop.permute.xlu1 %559 }
 0x10a   :  { %v562_v27 = vadd.f32 %v560_v10, %v554_v22 }
 0x10d   :  { %v568_v26 = vpop.permute.xlu1 %567 }
 0x10e   :  { %v570_v32 = vadd.f32 %v568_v26, %v562_v27 }
 0x111   :  { %v576_v36 = vpop.permute.xlu1 %575 }
 0x112   :  { %v578_v30 = vadd.f32 %v576_v36, %v570_v32 }
 0x155   :  { %v1083_v12 = vpop.permute.xlu0 %1082 }
 0x156   :  { %v1085_v16 = vunpack.i.h.bf16 %v1083_v12  ;;  %v1084_v20 = vunpack.i.l.bf16 %v1083_v12 }
 0x158   :  { %v323_v23 = vsel %vm321_vm7, %v78_v15, %v1085_v16  ;;  %v322_v21 = vsel %vm321_vm7, %v77_v14, %v1084_v20  ;;  %v1134_v16 = vmov 839922192  }
 0x159   :  { %v327_v6 = vpack.c.bf16 %v323_v23, %v322_v21  ;;  %v556_v25 = vpop.permute.xlu0 %555  ;;  %v730_v20 = vunpack.c.l.s4 %v1134_v16  ;;  %v1135_v23 = vmov 1985246804  }
 0x15a   :  { %v558_v29 = vadd.f32 %v556_v25, %v550_v0  ;;  %v737_v21 = vunpack.c.l.s4 %v1135_v23 }
 0x15b   :  { %1024 = vmatmul.mubr.msk.bf16.vlgmr.msra.gmra.mrb[0].mxu0 %vm331_vm15, %v327_v6  ;;  %v731_v22 = vunpack.c.0.s8 %v730_v20 }
 0x15c   :  { %1034 = vmatpush3.bf16.msra.mxu0 %v1352_v53  ;;  %1035 = vmatprep.mubr.msk.bf16.mxu0 %vm1130_vm9, %v1129_v43  ;;  %v738_v0 = vunpack.c.0.s8 %v737_v21 }
 0x15d   :  { %v564_v28 = vpop.permute.xlu0 %563  ;;  %v1419_v26 = vsub.s32 %v731_v22, %v399_v58 }
 0x15e   :  { %v566_v24 = vadd.f32 %v564_v28, %v558_v29  ;;  %v741_v29 = vsub.s32 %v738_v0, %v399_v58 }
 0x161   :  { %v572_v37 = vpop.permute.xlu0 %571 }
 0x162   :  { %v574_v41 = vadd.f32 %v572_v37, %v566_v24 }
 0x163   :  { %1036 = vmatmul.mubr.msk.bf16.vlgmr.msra.gmra.mrb[4].mxu0 %vm321_vm7, %v675_v39 }
 0x164   :  { %v579_v11 = vmul.f32 %v574_v41, %v574_v41 }
 0x165   :  { %v329_v45 = vpop.permute.xlu0 %328 }
 0x166   :  { %v580_v31 = vsub.f32 %v579_v11, %v578_v30  ;;  %v1428_v30 = vsub.s32 %v1312_v8, %v399_v58 }
 0x168   :  { %v581_v44 = vmul.f32 0.5, %v580_v31 }
 0x16a   :  { %v620_v53 = vpack.c.bf16 %v581_v44, %v581_v44 }
 0x16c   :  { %1030 = vmatmul.mubr.msk.bf16.vlgmr.msra.gmra.mrb[0].mxu1 %vm321_vm7, %v620_v53 }
 0x16d   :  { %1043 = vmatprep.mubr.msk.bf16.mxu1 %vm1130_vm9, %v1129_v43  ;;  %vm968_vm9 = vcmask 123904  }
 0x22e   :  { %v369_v42 = vpop.f32.mrb[0].mxu0 }
 0x22f   :  { %v1386_v46 = vadd.f32 %v369_v42, %v329_v45  ;;  %v1025_v2 = vpop.f32.mrb[1].mxu0 }
 0x230   :  { %v372_v35 = vpop.f32.mrb[2].mxu0 }
 0x231   :  { %v1388_v34 = vadd.f32 %v372_v35, %v329_v45  ;;  %378 = vrot.lane.b32.xlu1 %v1386_v46, %s1132_s6  ;;  %v1026_v18 = vpop.f32.mrb[3].mxu0 }
 0x233   :  { %380 = vrot.lane.b32.xlu0 %v1388_v34, %s1132_s6 }
 0x236   :  { %v1392_v19 = vpop.f32.mrb[4].mxu0 }
 0x237   :  { %v1037_v47 = vpop.f32.mrb[5].mxu0 }
 0x238   :  { %v716_v48 = vpop.f32.mrb[6].mxu0 }
 0x239   :  { %v1038_v49 = vpop.f32.mrb[7].mxu0 }
 0x23f   :  { %v1394_v38 = vpop.f32.mrb[0].mxu1 }
 0x240   :  { %720 = vrot.lane.b32.xlu1 %v1394_v38, %s1116_s18  ;;  %v1031_v50 = vpop.f32.mrb[1].mxu1 }
 0x241   :  { %v665_v40 = vpop.f32.mrb[2].mxu1 }
 0x242   :  { %v1032_v51 = vpop.f32.mrb[3].mxu1 }
 0x2a3   :  { %v379_v33 = vpop.permute.xlu1 %378 }
 0x2a4   :  { %v384_v63 = vmul.f32 %v379_v33, %v1386_v46 }
 0x2a5   :  { %v381_v52 = vpop.permute.xlu0 %380 }
 0x2a6   :  { %v385_v54 = vmul.f32 %v381_v52, %v1388_v34  ;;  %v387_v4 = vsel %vm386_vm0, %v384_v63, 0.0 }
 0x2a8   :  { %v390_v55 = vsel %vm386_vm0, %v385_v54, 0.0 }
 0x2a9   :  { %391 = vadd.xlane.f32.xlu1 %v390_v55 }
 0x2b2   :  { %v721_v1 = vpop.permute.xlu1 %720 }
 0x2b3   :  { %v723_v62 = vmul.f32 %v721_v1, %v1394_v38 }
 0x2b5   :  { %v724_v17 = vsel %vm321_vm7, %v723_v62, 0.0  ;;  %vm915_vm7 = vcmask 228352  }
 0x2b6   :  { %725 = vadd.xlane.f32.xlu0 %v724_v17 }
 0x2ba   :  { %388 = vadd.xlane.f32.xlu0 %v387_v4  ;;  %412 = vbcast.lane.b32.xlu1 %v409_v13, 320 }
 0x2d0   :  { %404 = vbcast.lane.b32.xlu0 %v401_v5, 320 }
 0x336   :  { %v392_v9 = vpop.xlane.xlu1 %391 }
 0x337   :  { %v394_v10 = vmul.f32 0.28867513, %v392_v9 }
 0x33a   :  { %v413_v12 = vpop.permute.xlu1 %412 }
 0x33b   :  { %v417_v14 = vsub.f32 %v394_v10, %v413_v12 }
 0x33d   :  { %424 = vperm.xlu0 %1087, %v417_v14  }
 0x341   :  { %746 = vrot.lane.b32.xlu0 %v1392_v19, %s1116_s18  ;;  %s1136_s18 = smov 76  }
 0x343   :  { %v726_v15 = vpop.xlane.xlu0 %725 }
 0x344   :  { %v727_v27 = vmul.f32 0.35355338, %v726_v15 }
 0x346   :  { %v735_v32 = vrot.slane %v727_v27, %v1419_v26  ;;  %v1422_v24 = vrot.slane %v727_v27, %v741_v29 }
 0x347   :  { %v389_v7 = vpop.xlane.xlu0 %388 }
 0x348   :  { %v393_v6 = vmul.f32 0.28867513, %v389_v7 }
 0x34b   :  { %v405_v25 = vpop.permute.xlu0 %404 }
 0x34c   :  { %v416_v28 = vsub.f32 %v393_v6, %v405_v25 }
 0x34e   :  { %421 = vperm.xlu1 %1086, %v416_v28  }
 0x352   :  { %755 = vperm.xlu1 %1086, %v735_v32  }
 0x356   :  { %758 = vperm.xlu1 %1086, %v1422_v24  }
 0x3bc   :  { %v425_v36 = vpop.permute.xlu0 %424 }
 0x3bd   :  { %v433_v31 = vrot.slane %v425_v36, %v1428_v30 }
 0x3c0   :  { %v747_v37 = vpop.permute.xlu0 %746 }
 0x3c1   :  { %v749_v39 = vmul.f32 %v747_v37, %v1392_v19 }
 0x3c3   :  { %v750_v41 = vsel %vm437_vm1, %v749_v39, 0.0 }
 0x3c4   :  { %751 = vadd.xlane.f32.xlu0 %v750_v41 }
 0x3cd   :  { %v422_v11 = vpop.permute.xlu1 %421 }
 0x3ce   :  { %v429_v44 = vrot.slane %v422_v11, %v1428_v30 }
 0x3d0   :  { %v435_v53 = vsel %vm434_vm14, %v433_v31, %v429_v44 }
 0x3d1   :  { %v756_v45 = vpop.permute.xlu1 %755  ;;  %v438_v42 = vsel %vm437_vm1, %v435_v53, -inf }
 0x3d2   :  { %439 = vmax.xlane.f32.xlu1 %v438_v42  ;;  %v763_v35 = vrot.slane %v756_v45, %v1428_v30 }
 0x3d5   :  { %v759_v2 = vpop.permute.xlu1 %758 }
 0x3d6   :  { %v767_v18 = vrot.slane %v759_v2, %v1428_v30 }
 0x3d8   :  { %v768_v8 = vsel %vm434_vm14, %v767_v18, %v763_v35 }
 0x3d9   :  { %v771_v47 = vsel %vm770_vm2, %v768_v8, -inf }
 0x3da   :  { %772 = vmax.xlane.f32.xlu0 %v771_v47 }
 0x451   :  { %v752_v52 = vpop.xlane.xlu0 %751 }
 0x452   :  { %v753_v58 = vmul.f32 0.35355338, %v752_v52 }
 0x45f   :  { %v440_v48 = vpop.xlane.xlu1 %439 }
 0x460   :  { %v445_v49 = vrot.slane %v440_v48, %v1414_v56  ;;  %v449_v50 = vrot.slane %v440_v48, %v1407_v3 }
 0x462   :  { %v452_v40 = vsub.f32 %v416_v28, %v445_v49  ;;  %v453_v51 = vsub.f32 %v417_v14, %v449_v50 }
 0x464   :  { %v454_v54 = vmul.f32 1.442695, %v452_v40  ;;  %v456_v55 = vmul.f32 1.442695, %v453_v51 }
 0x466   :  { %1097 = vpow2.f32 %v454_v54 }
 0x467   :  { %1099 = vpow2.f32 %v456_v55  ;;  %v773_v33 = vpop.xlane.xlu0 %772 }
 0x468   :  { %v774_v59 = vmax.f32 %v773_v33, %v753_v58 }
 0x46a   :  { %v805_v1 = vsub.f32 %v753_v58, %v774_v59  ;;  %v782_v62 = vrot.slane %v774_v59, %v1419_v26 }
 0x46c   :  { %v806_v61 = vmul.f32 1.442695, %v805_v1  ;;  %v786_v13 = vrot.slane %v782_v62, %v1414_v56  ;;  %v793_v4 = vrot.slane %v782_v62, %v1407_v3 }
 0x46e   :  { %1101 = vpow2.f32 %v806_v61 }
 0x470   :  { %v1098_v63 = vpop.eup %1097 }
 0x471   :  { %v1441_v17 = vpop.eup %1099  ;;  %461 = vperm.xlu1 %1086, %v1098_v63  }
 0x472   :  { %464 = vperm.xlu0 %1087, %v1441_v17  }
 0x475   :  { %788 = vbcast.lane.b32.xlu1 %v786_v13, 256 }
 0x478   :  { %v1446_v60 = vpop.eup %1101 }
 0x479   :  { %795 = vbcast.lane.b32.xlu1 %v793_v4, 256  ;;  %v866_v5 = vmul.f32 %v1446_v60, %v1392_v19 }
 0x47b   :  { %v868_v55 = vrot.slane %v866_v5, 1 }
 0x4f0   :  { %v462_v9 = vpop.permute.xlu1 %461 }
 0x4f1   :  { %v465_v10 = vpop.permute.xlu0 %464  ;;  %v469_v12 = vrot.slane %v462_v9, %v1428_v30 }
 0x4f2   :  { %v473_v14 = vrot.slane %v465_v10, %v1428_v30 }
 0x4f4   :  { %v789_v15 = vpop.permute.xlu1 %788  ;;  %v474_v16 = vsel %vm434_vm14, %v473_v14, %v469_v12 }
 0x4f5   :  { %v799_v20 = vsub.f32 %v735_v32, %v789_v15  ;;  %v476_v7 = vsel %vm437_vm1, %v474_v16, 0.0  ;;  %v831_v32 = vcombine.high %v1394_v38, %v1394_v38  ;;  %v902_v15 = vld [vmem:[%s1498_s2 + $0x38] sm:$0xf] }
 0x4f6   :  { %477 = vadd.xlane.f32.xlu0 %v476_v7 }
 0x4f7   :  { %v801_v22 = vmul.f32 1.442695, %v799_v20 }
 0x4f8   :  { %v796_v23 = vpop.permute.xlu1 %795 }
 0x4f9   :  { %1103 = vpow2.f32 %v801_v22  ;;  %v800_v21 = vsub.f32 %v1422_v24, %v796_v23 }
 0x4fb   :  { %v803_v6 = vmul.f32 1.442695, %v800_v21 }
 0x4fd   :  { %1105 = vpow2.f32 %v803_v6 }
 0x503   :  { %v1104_v19 = vpop.eup %1103 }
 0x504   :  { %811 = vperm.xlu1 %1086, %v1104_v19  }
 0x507   :  { %v1106_v25 = vpop.eup %1105 }
 0x508   :  { %814 = vperm.xlu1 %1086, %v1106_v25  }
 0x583   :  { %v478_v0 = vpop.xlane.xlu0 %477  ;;  %v812_v27 = vpop.permute.xlu1 %811 }
 0x584   :  { %1107 = vrcp.f32 %v478_v0  ;;  %v840_v28 = vrot.slane %v812_v27, %v1419_v26  ;;  %v819_v24 = vrot.slane %v812_v27, %v1428_v30  ;;  %v1010_v27 = vld [vmem:[%s1498_s2] ss:$0 sm:$0xff] }
 0x586   :  { %v849_v29 = vmul.f32 %v840_v28, %v1394_v38 }
 0x587   :  { %v815_v36 = vpop.permute.xlu1 %814 }
 0x588   :  { %v852_v37 = vsel %vm851_vm3, %v849_v29, 0.0  ;;  %v823_v39 = vrot.slane %v815_v36, %v1428_v30  ;;  %v848_v41 = vrot.slane %v815_v36, %v1419_v26 }
 0x589   :  { %v853_v11 = vrot.slane %v852_v37, 4 }
 0x58a   :  { %v850_v31 = vmul.f32 %v848_v41, %v831_v32  ;;  %v824_v44 = vsel %vm434_vm14, %v823_v39, %v819_v24 }
 0x58b   :  { %v854_v53 = vadd.f32 %v853_v11, %v852_v37  ;;  %v826_v45 = vsel %vm770_vm2, %v824_v44, 0.0 }
 0x58c   :  { %v859_v42 = vsel %vm851_vm3, %v850_v31, 0.0  ;;  %827 = vadd.xlane.f32.xlu1 %v826_v45 }
 0x58d   :  { %v855_v2 = vrot.slane %v854_v53, 2  ;;  %v860_v35 = vrot.slane %v859_v42, 4 }
 0x58e   :  { %v1108_v38 = vpop.eup %1107 }
 0x58f   :  { %v856_v18 = vadd.f32 %v855_v2, %v854_v53  ;;  %v861_v8 = vadd.f32 %v860_v35, %v859_v42  ;;  %v484_v47 = vrot.slane %v1108_v38, %v1414_v56  ;;  %v488_v52 = vrot.slane %v1108_v38, %v1407_v3 }
 0x591   :  { %v857_v48 = vrot.slane %v856_v18, 1  ;;  %v862_v30 = vrot.slane %v861_v8, 2  ;;  %v491_v49 = vmul.f32 %v1098_v63, %v484_v47  ;;  %v492_v33 = vmul.f32 %v1441_v17, %v488_v52  ;;  %v899_v17 = vld [vmem:[%s1498_s2 + $0x20] sm:$0xff] }
 0x593   :  { %v863_v26 = vadd.f32 %v862_v30, %v861_v8  ;;  %495 = vperm.xlu0 %1087, %v491_v49   ;;  %v858_v50 = vadd.f32 %v857_v48, %v856_v18 }
 0x595   :  { %v864_v40 = vrot.slane %v863_v26, 1  ;;  %v871_v51 = vadd.f32 %v866_v5, %v858_v50 }
 0x597   :  { %v865_v54 = vadd.f32 %v864_v40, %v863_v26  ;;  %v1139_v26 = vmov 84  }
 0x598   :  { %1088 = vset.pattern.permute.xlu0 %v1139_v26 }
 0x599   :  { %v872_v58 = vadd.f32 %v868_v55, %v865_v54 }
 0x59d   :  { %500 = vperm.xlu1 %1086, %v492_v33  }
 0x5a1   :  { %912 = vrot.lane.b32.xlu1 %v1010_v27, %s1136_s18 }
 0x5a5   :  { %972 = vrot.lane.b32.xlu1 %v1403_v57, %s1119_s0 }
 0x612   :  { %v496_v59 = vpop.permute.xlu0 %495 }
 0x613   :  { %v503_v1 = vmul.f32 %v496_v59, %v1386_v46  ;;  %v900_v46 = vld [vmem:[%s1498_s2 + $0x28] sm:$0xff] }
 0x614   :  { %v903_v10 = vpack.c.bf16 %v900_v46, %v899_v17 }
 0x615   :  { %v506_v56 = vsel %vm505_vm4, %v503_v1, 0.0 }
 0x616   :  { %v507_v63 = vrot.slane %v506_v56, 4  ;;  %1040 = vmatpush3.bf16.msra.mxu1 %v903_v10 }
 0x617   :  { %1041 = vmatprep.subr.bf16.mxu1 %v1129_v43 }
 0x618   :  { %v508_v3 = vadd.f32 %v507_v63, %v506_v56 }
 0x619   :  { %v828_v61 = vpop.xlane.xlu1 %827 }
 0x61a   :  { %v829_v62 = vadd.f32 %v1446_v60, %v828_v61  ;;  %v509_v12 = vrot.slane %v508_v3, 2 }
 0x61c   :  { %1109 = vrcp.f32 %v829_v62  ;;  %v510_v7 = vadd.f32 %v509_v12, %v508_v3 }
 0x61d   :  { %v501_v13 = vpop.permute.xlu1 %500 }
 0x61e   :  { %v504_v4 = vmul.f32 %v501_v13, %v1388_v34  ;;  %v901_v34 = vld [vmem:[%s1498_s2 + $0x30] sm:$0xff]  ;;  %v511_v43 = vrot.slane %v510_v7, 1 }
 0x61f   :  { %v904_v20 = vpack.c.bf16 %v902_v15, %v901_v34 }
 0x620   :  { %v513_v9 = vsel %vm505_vm4, %v504_v4, 0.0  ;;  %v512_v32 = vadd.f32 %v511_v43, %v510_v7 }
 0x621   :  { %v514_v5 = vrot.slane %v513_v9, 4  ;;  %v921_v6 = vsel %vm919_vm5, %v904_v20, 0  ;;  %v913_v44 = vpop.permute.xlu1 %912 }
 0x622   :  { %1042 = vmatpush3.bf16.msra.mxu1 %v921_v6 }
 0x623   :  { %v515_v14 = vadd.f32 %v514_v5, %v513_v9 }
 0x625   :  { %v516_v60 = vrot.slane %v515_v14, 2  ;;  %v973_v53 = vpop.permute.xlu1 %972 }
 0x626   :  { %v1110_v16 = vpop.eup %1109  ;;  %v975_v45 = vmul.f32 %v973_v53, %v1403_v57 }
 0x627   :  { %v517_v22 = vadd.f32 %v516_v60, %v515_v14  ;;  %v874_v23 = vrot.slane %v1110_v16, 1  ;;  %v877_v21 = vmul.f32 %v1110_v16, %v871_v51 }
 0x628   :  { %v977_v42 = vsel %vm976_vm8, %v975_v45, 0.0 }
 0x629   :  { %v518_v19 = vrot.slane %v517_v22, 1  ;;  %v878_v25 = vmul.f32 %v874_v23, %v872_v58  ;;  %978 = vadd.xlane.f32.xlu1 %v977_v42 }
 0x62b   :  { %v887_v0 = vrot.slane %v878_v25, 7  ;;  %v519_v29 = vadd.f32 %v518_v19, %v517_v22 }
 0x62d   :  { %v888_v28 = vsel %vm434_vm14, %v887_v0, %v877_v21  ;;  %v881_v36 = vsel %vm434_vm14, %v519_v29, %v512_v32 }
 0x62e   :  { %889 = vrot.lane.b32.xlu0 %v888_v28, %s1137_s19 }
 0x632   :  { %882 = vrot.lane.b32.xlu0 %v881_v36, %s1118_s20 }
 0x636   :  { %893 = vrot.lane.b32.xlu0 %v1403_v57, %s1136_s18 }
 0x63a   :  { %964 = vrot.lane.b32.xlu0 %v1010_v27, %s1138_s21 }
 0x6a0   :  { %v890_v24 = vpop.permute.xlu0 %889 }
 0x6a4   :  { %v883_v37 = vpop.permute.xlu0 %882 }
 0x6a5   :  { %v896_v39 = vsel %vm386_vm0, %v883_v37, %v890_v24 }
 0x6a8   :  { %v894_v41 = vpop.permute.xlu0 %893 }
 0x6a9   :  { %v898_v11 = vsel %vm897_vm6, %v896_v39, %v894_v41 }
 0x6aa   :  { %v905_v31 = vpack.c.bf16 %v898_v11, %v898_v11 }
 0x6ac   :  { %1044 = vmatmul.mubr.msk.bf16.vlgmr.msra.gmra.mrb[4].mxu1 %vm915_vm7, %v905_v31  ;;  %v965_v8 = vpop.permute.xlu0 %964 }
 0x6b6   :  { %v979_v50 = vpop.xlane.xlu1 %978 }
 0x77f   :  { %v957_v2 = vpop.f32.mrb[4].mxu1 }
 0x780   :  { %v958_v35 = vadd.f32 %v957_v2, %v913_v44  ;;  %v1045_v38 = vpop.f32.mrb[5].mxu1 }
 0x781   :  { %v960_v18 = vpop.f32.mrb[6].mxu1 }
 0x782   :  { %v963_v47 = vmax.f32 %v958_v35, 0.0  ;;  %v1046_v48 = vpop.f32.mrb[7].mxu1 }
 0x784   :  { %v967_v30 = vmul.f32 %v965_v8, %v963_v47 }
 0x786   :  { %v969_v49 = vsel %vm968_vm9, %v967_v30, 0.0 }
 0x787   :  { %970 = vadd.xlane.f32.xlu0 %v969_v49 }
 0x814   :  { %v971_v40 = vpop.xlane.xlu0 %970 }
 0x815   :  { %v980_v51 = vadd.f32 %v979_v50, %v971_v40 }
 0x817   :  { %v981_v57 = vadd.f32 %v1010_v27, %v980_v51 }
 0x819   :  { %v982_v52 = vsub.f32 0.0, %v981_v57 }
 0x81b   :  { %v983_v54 = vmul.f32 1.442695, %v982_v52 }
 0x81d   :  { %1111 = vpow2.f32 %v983_v54 }
 0x827   :  { %v1112_v55 = vpop.eup %1111 }
 0x828   :  { %v985_v58 = vadd.f32 1.0, %v1112_v55 }
 0x82a   :  { %1113 = vrcp.f32 %v985_v58 }
 0x834   :  { %v1114_v33 = vpop.eup %1113 }
 0x835   :  { %990 = vperm.xlu0 %1088, %v1114_v33  }
 0x8b4   :  { %v991_v59 = vpop.permute.xlu0 %990 }
 0x8b5   :  { %993 = vst [vmem:[%s1500_s3] sm:$0x3] %v991_v59 }

</bundles_post_ra>
